<compile_context>
chip_gen: v5e
topology: v5e:2x2
jax: 0.10.0
libtpu: 0.0.40
codegen_flags: <defaults>
</compile_context>

<pallas_src>
import jax
import jax.numpy as jnp
from jax.experimental import pallas as pl
from jax.experimental.pallas import tpu as pltpu

SMOOTH = 1e-4
NUM_CORES = 2          # leading 'parallel' grid axis (2-TC megacore split on v7x)


def _cdiv(a, b):
    return -(-a // b)


def _round_up(x, m):
    return _cdiv(x, m) * m


def _dice_partials_kernel(logits_ref, target_ref,          # inputs  [C,T], [1,T]
                          sp_ref, st_ref, spt_ref,          # outputs [1,C,1] x3 (per core)
                          acc_p, acc_t, acc_pt):            # scratch [C,T] f32 x3
    j = pl.program_id(1)

    @pl.when(j == 0)
    def _init():
        acc_p[...] = jnp.zeros_like(acc_p)
        acc_t[...] = jnp.zeros_like(acc_t)
        acc_pt[...] = jnp.zeros_like(acc_pt)

    # Upcast after the tile lands in VMEM (input may be bf16 to halve HBM traffic).
    logits = logits_ref[...].astype(jnp.float32)            # [C, T]
    tgt = target_ref[...]                                    # [1, T] int32, padded cols = -1

    # Softmax over the class (sublane) axis; reciprocal on the EUP slot.
    m = jnp.max(logits, axis=0, keepdims=True)               # [1, T]
    e = jnp.exp(logits - m)                                   # [C, T]
    p = e * pl.reciprocal(jnp.sum(e, axis=0, keepdims=True), approx=True)

    # Mask padded tokens so they add no softmax mass to the per-class denominators.
    valid = (tgt >= 0).astype(jnp.float32)                    # [1, T]
    p = p * valid

    # One-hot target: class iota along sublanes vs lane-major target indices
    # (target == -1 for padded tokens never matches, so t is already 0 there).
    class_ids = jax.lax.broadcasted_iota(jnp.int32, p.shape, 0)
    t = (class_ids == tgt).astype(jnp.float32)                # [C, T]

    # Pure elementwise accumulation in VMEM (lane reductions deferred to the epilogue).
    acc_p[...] += p
    acc_t[...] += t
    acc_pt[...] += p * t

    @pl.when(j == pl.num_programs(1) - 1)
    def _finalize():
        sp = jnp.sum(acc_p[...], axis=1, keepdims=True)       # [C, 1]
        st = jnp.sum(acc_t[...], axis=1, keepdims=True)
        spt = jnp.sum(acc_pt[...], axis=1, keepdims=True)
        sp_ref[...] = sp.reshape(sp_ref.shape)
        st_ref[...] = st.reshape(st_ref.shape)
        spt_ref[...] = spt.reshape(spt_ref.shape)


def dice_loss(logits: jax.Array, target: jax.Array, *, tile_n: int = 8192) -> jax.Array:
    """logits: [N, C] float32/bfloat16 ; target: [N] int class indices. Returns scalar f32.

    tile_n: tokens per grid step (multiple of 128). Defaults work for v5e/v6e/v7x; raise
    toward 16384 on v5e/v6e, keep 2048-8192 on v7x (64 MiB VMEM) -- with small C all fit.
    """
    n, c = logits.shape

    # Lane-dense layout: tokens on the 128-lane axis, classes on sublanes.
    # (In a real pipeline the producer should emit class-major [C, N] directly.)
    logits_cn = jnp.transpose(logits)                         # [C, N], dtype preserved
    target_1n = target.reshape(1, n).astype(jnp.int32)        # [1, N]

    # Tile sizing + padding so N_pad = NUM_CORES * chunks_per_core * tile_n.
    tile_n = max(128, (tile_n // 128) * 128)
    tile_n = min(tile_n, _round_up(max(_cdiv(n, NUM_CORES), 1), 128))
    per_core = _round_up(_cdiv(n, NUM_CORES), tile_n)
    chunks_per_core = per_core // tile_n
    n_pad = NUM_CORES * per_core
    if n_pad != n:
        logits_cn = jnp.pad(logits_cn, ((0, 0), (0, n_pad - n)))
        target_1n = jnp.pad(target_1n, ((0, 0), (0, n_pad - n)), constant_values=-1)

    block_idx = lambda core, j: (0, core * chunks_per_core + j)
    part_idx = lambda core, j: (core, 0, 0)
    part_shape = jax.ShapeDtypeStruct((NUM_CORES, c, 1), jnp.float32)

    sp, st, spt = pl.pallas_call(
        _dice_partials_kernel,
        grid_spec=pltpu.PrefetchScalarGridSpec(
            num_scalar_prefetch=0,
            grid=(NUM_CORES, chunks_per_core),
            in_specs=[
                pl.BlockSpec((c, tile_n), block_idx),          # logits tile [C, T]
                pl.BlockSpec((1, tile_n), block_idx),          # target tile [1, T]
            ],
            out_specs=[
                pl.BlockSpec((1, c, 1), part_idx),
                pl.BlockSpec((1, c, 1), part_idx),
                pl.BlockSpec((1, c, 1), part_idx),
            ],
            scratch_shapes=[pltpu.VMEM((c, tile_n), jnp.float32)] * 3,
        ),
        out_shape=(part_shape, part_shape, part_shape),
        compiler_params=pltpu.CompilerParams(
            dimension_semantics=("parallel", "arbitrary"),
            vmem_limit_bytes=32 * 1024 * 1024,
        ),
    )(logits_cn, target_1n)

    # Tiny epilogue: combine per-core partial sums and do the only C divisions.
    s_p = jnp.sum(sp, axis=0)[:, 0]                            # [C]
    s_t = jnp.sum(st, axis=0)[:, 0]
    s_pt = jnp.sum(spt, axis=0)[:, 0]
    denom = s_p + s_t + jnp.float32(SMOOTH)
    numer = 2.0 * s_pt + jnp.float32(n) * jnp.float32(SMOOTH)
    return jnp.float32(c) - jnp.sum(numer / denom) / jnp.float32(n)


def dice_loss_ref(logits, target):
    """Pure-JAX reference mirroring the PyTorch default path."""
    n, c = logits.shape
    p = jax.nn.softmax(logits.astype(jnp.float32), axis=1)
    t = jax.nn.one_hot(target, c, dtype=jnp.float32)
    denom = p.sum(axis=0) + t.sum(axis=0) + SMOOTH             # [C]
    loss_nc = 1.0 - (2.0 * p * t + SMOOTH) / denom[None, :]    # [N, C]
    return loss_nc.sum(axis=1).mean()


if __name__ == "__main__":
    key = jax.random.PRNGKey(0)
    k1, k2, k3, k4 = jax.random.split(key, 4)

    # Test 1: f32 logits, N divisible by the tile -> exercises multi-step accumulation
    # (grid = (2 cores, 2 chunks) with tile_n=128).
    N1, C1 = 512, 8   # e.g. batch=16 x seq=32 flattened tokens, 8 classes
    logits1 = jax.random.normal(k1, (N1, C1), dtype=jnp.float32)
    target1 = jax.random.randint(k2, (N1,), 0, C1, dtype=jnp.int32)
    out1 = dice_loss(logits1, target1, tile_n=128)
    jax.block_until_ready(out1)
    ref1 = dice_loss_ref(logits1, target1)
    assert jnp.allclose(out1, ref1, atol=1e-4, rtol=1e-4), (out1, ref1)

    # Test 2: bf16 logits, ragged N (exercises padding/masking of the last tile).
    N2, C2 = 300, 16
    logits2 = jax.random.normal(k3, (N2, C2), dtype=jnp.float32).astype(jnp.bfloat16)
    target2 = jax.random.randint(k4, (N2,), 0, C2, dtype=jnp.int32)
    out2 = dice_loss(logits2, target2)
    jax.block_until_ready(out2)
    ref2 = dice_loss_ref(logits2, target2)
    assert jnp.allclose(out2, ref2, atol=1e-3, rtol=1e-3), (out2, ref2)

    print("KERNEL_OK")
</pallas_src>

<mosaic_0001>
module attributes {stable_mosaic.version = 11 : i64} {
  func.func @_dice_partials_kernel(%arg0: i32, %arg1: i32, %arg2: memref<8x128xf32, #tpu.memory_space<vmem>>, %arg3: memref<1x128xi32, #tpu.memory_space<vmem>>, %arg4: memref<1x8x1xf32, #tpu.memory_space<vmem>>, %arg5: memref<1x8x1xf32, #tpu.memory_space<vmem>>, %arg6: memref<1x8x1xf32, #tpu.memory_space<vmem>>, %arg7: memref<8x128xf32, #tpu.memory_space<vmem>>, %arg8: memref<8x128xf32, #tpu.memory_space<vmem>>, %arg9: memref<8x128xf32, #tpu.memory_space<vmem>>) attributes {dimension_semantics = [#tpu.dimension_semantics<parallel>, #tpu.dimension_semantics<arbitrary>], iteration_bounds = array<i64: 2, 2>, scalar_prefetch = 0 : i64, scratch_operands = 3 : i64, tpu.core_type = #tpu.core_type<tc>, window_params = [{transform_indices = @transform_0, window_bounds = array<i64: 8, 128>}, {transform_indices = @transform_1, window_bounds = array<i64: 1, 128>}, {transform_indices = @transform_2, window_bounds = array<i64: 1, 8, 1>}, {transform_indices = @transform_3, window_bounds = array<i64: 1, 8, 1>}, {transform_indices = @transform_4, window_bounds = array<i64: 1, 8, 1>}]} {
    %c0_i32 = arith.constant 0 : i32
    %0 = arith.cmpi eq, %arg1, %c0_i32 : i32
    %1 = arith.extui %0 : i1 to i32
    %c0_i32_0 = arith.constant 0 : i32
    %2 = arith.cmpi ne, %1, %c0_i32_0 : i32
    scf.if %2 {
      %cst_19 = arith.constant 0.000000e+00 : f32
      %39 = vector.broadcast %cst_19 : f32 to vector<8x128xf32>
      %c0_20 = arith.constant 0 : index
      %c0_21 = arith.constant 0 : index
      %40 = vector.load %arg7[%c0_20, %c0_21] : memref<8x128xf32, #tpu.memory_space<vmem>>, vector<8x128xf32>
      tpu.vector_store %arg7[%c0_20, %c0_21], %39 {strides = array<i32>} : memref<8x128xf32, #tpu.memory_space<vmem>>, vector<8x128xf32>,
      %cst_22 = arith.constant 0.000000e+00 : f32
      %41 = vector.broadcast %cst_22 : f32 to vector<8x128xf32>
      %c0_23 = arith.constant 0 : index
      %c0_24 = arith.constant 0 : index
      %42 = vector.load %arg8[%c0_23, %c0_24] : memref<8x128xf32, #tpu.memory_space<vmem>>, vector<8x128xf32>
      tpu.vector_store %arg8[%c0_23, %c0_24], %41 {strides = array<i32>} : memref<8x128xf32, #tpu.memory_space<vmem>>, vector<8x128xf32>,
      %cst_25 = arith.constant 0.000000e+00 : f32
      %43 = vector.broadcast %cst_25 : f32 to vector<8x128xf32>
      %c0_26 = arith.constant 0 : index
      %c0_27 = arith.constant 0 : index
      %44 = vector.load %arg9[%c0_26, %c0_27] : memref<8x128xf32, #tpu.memory_space<vmem>>, vector<8x128xf32>
      tpu.vector_store %arg9[%c0_26, %c0_27], %43 {strides = array<i32>} : memref<8x128xf32, #tpu.memory_space<vmem>>, vector<8x128xf32>,
    } else {
    }
    %c0 = arith.constant 0 : index
    %c0_1 = arith.constant 0 : index
    %3 = vector.load %arg2[%c0, %c0_1] : memref<8x128xf32, #tpu.memory_space<vmem>>, vector<8x128xf32>
    %c0_2 = arith.constant 0 : index
    %c0_3 = arith.constant 0 : index
    %4 = vector.load %arg3[%c0_2, %c0_3] : memref<1x128xi32, #tpu.memory_space<vmem>>, vector<1x128xi32>
    %cst = arith.constant dense<0xFF800000> : vector<128xf32>
    %5 = vector.multi_reduction <maximumf>, %3, %cst [0] : vector<8x128xf32> to vector<128xf32>
    %6 = vector.shape_cast %5 : vector<128xf32> to vector<1x128xf32>
    %7 = vector.broadcast %6 : vector<1x128xf32> to vector<8x128xf32>
    %8 = arith.subf %3, %7 : vector<8x128xf32>
    %9 = math.exp %8 : vector<8x128xf32>
    %cst_4 = arith.constant dense<0.000000e+00> : vector<128xf32>
    %10 = vector.multi_reduction <add>, %9, %cst_4 [0] : vector<8x128xf32> to vector<128xf32>
    %11 = vector.shape_cast %10 : vector<128xf32> to vector<1x128xf32>
    %12 = tpu.reciprocal %11 {approx = true} : vector<1x128xf32> -> vector<1x128xf32>
    %13 = vector.broadcast %12 : vector<1x128xf32> to vector<8x128xf32>
    %14 = arith.mulf %9, %13 : vector<8x128xf32>
    %c0_i32_5 = arith.constant 0 : i32
    %15 = vector.broadcast %c0_i32_5 : i32 to vector<1x128xi32>
    %16 = arith.cmpi sge, %4, %15 : vector<1x128xi32>
    %17 = arith.extui %16 : vector<1x128xi1> to vector<1x128xi32>
    %18 = arith.sitofp %17 : vector<1x128xi32> to vector<1x128xf32>
    %19 = vector.broadcast %18 : vector<1x128xf32> to vector<8x128xf32>
    %20 = arith.mulf %14, %19 : vector<8x128xf32>
    %21 = tpu.iota {dimensions = array<i32: 0>} : vector<8x128xi32>
    %22 = vector.broadcast %4 : vector<1x128xi32> to vector<8x128xi32>
    %23 = arith.cmpi eq, %21, %22 : vector<8x128xi32>
    %24 = arith.extui %23 : vector<8x128xi1> to vector<8x128xi32>
    %25 = arith.sitofp %24 : vector<8x128xi32> to vector<8x128xf32>
    %c0_6 = arith.constant 0 : index
    %c0_7 = arith.constant 0 : index
    %26 = vector.load %arg7[%c0_6, %c0_7] : memref<8x128xf32, #tpu.memory_space<vmem>>, vector<8x128xf32>
    %27 = arith.addf %26, %20 : vector<8x128xf32>
    %c0_8 = arith.constant 0 : index
    %c0_9 = arith.constant 0 : index
    %28 = vector.load %arg7[%c0_8, %c0_9] : memref<8x128xf32, #tpu.memory_space<vmem>>, vector<8x128xf32>
    tpu.vector_store %arg7[%c0_8, %c0_9], %27 {strides = array<i32>} : memref<8x128xf32, #tpu.memory_space<vmem>>, vector<8x128xf32>,
    %c0_10 = arith.constant 0 : index
    %c0_11 = arith.constant 0 : index
    %29 = vector.load %arg8[%c0_10, %c0_11] : memref<8x128xf32, #tpu.memory_space<vmem>>, vector<8x128xf32>
    %30 = arith.addf %29, %25 : vector<8x128xf32>
    %c0_12 = arith.constant 0 : index
    %c0_13 = arith.constant 0 : index
    %31 = vector.load %arg8[%c0_12, %c0_13] : memref<8x128xf32, #tpu.memory_space<vmem>>, vector<8x128xf32>
    tpu.vector_store %arg8[%c0_12, %c0_13], %30 {strides = array<i32>} : memref<8x128xf32, #tpu.memory_space<vmem>>, vector<8x128xf32>,
    %c0_14 = arith.constant 0 : index
    %c0_15 = arith.constant 0 : index
    %32 = vector.load %arg9[%c0_14, %c0_15] : memref<8x128xf32, #tpu.memory_space<vmem>>, vector<8x128xf32>
    %33 = arith.mulf %20, %25 : vector<8x128xf32>
    %34 = arith.addf %32, %33 : vector<8x128xf32>
    %c0_16 = arith.constant 0 : index
    %c0_17 = arith.constant 0 : index
    %35 = vector.load %arg9[%c0_16, %c0_17] : memref<8x128xf32, #tpu.memory_space<vmem>>, vector<8x128xf32>
    tpu.vector_store %arg9[%c0_16, %c0_17], %34 {strides = array<i32>} : memref<8x128xf32, #tpu.memory_space<vmem>>, vector<8x128xf32>,
    %c1_i32 = arith.constant 1 : i32
    %36 = arith.cmpi eq, %arg1, %c1_i32 : i32
    %37 = arith.extui %36 : i1 to i32
    %c0_i32_18 = arith.constant 0 : i32
    %38 = arith.cmpi ne, %37, %c0_i32_18 : i32
    scf.if %38 {
      %c0_19 = arith.constant 0 : index
      %c0_20 = arith.constant 0 : index
      %39 = vector.load %arg7[%c0_19, %c0_20] : memref<8x128xf32, #tpu.memory_space<vmem>>, vector<8x128xf32>
      %cst_21 = arith.constant dense<0.000000e+00> : vector<8xf32>
      %40 = vector.multi_reduction <add>, %39, %cst_21 [1] : vector<8x128xf32> to vector<8xf32>
      %41 = vector.shape_cast %40 : vector<8xf32> to vector<8x1xf32>
      %c0_22 = arith.constant 0 : index
      %c0_23 = arith.constant 0 : index
      %42 = vector.load %arg8[%c0_22, %c0_23] : memref<8x128xf32, #tpu.memory_space<vmem>>, vector<8x128xf32>
      %cst_24 = arith.constant dense<0.000000e+00> : vector<8xf32>
      %43 = vector.multi_reduction <add>, %42, %cst_24 [1] : vector<8x128xf32> to vector<8xf32>
      %44 = vector.shape_cast %43 : vector<8xf32> to vector<8x1xf32>
      %c0_25 = arith.constant 0 : index
      %c0_26 = arith.constant 0 : index
      %45 = vector.load %arg9[%c0_25, %c0_26] : memref<8x128xf32, #tpu.memory_space<vmem>>, vector<8x128xf32>
      %cst_27 = arith.constant dense<0.000000e+00> : vector<8xf32>
      %46 = vector.multi_reduction <add>, %45, %cst_27 [1] : vector<8x128xf32> to vector<8xf32>
      %47 = vector.shape_cast %46 : vector<8xf32> to vector<8x1xf32>
      %48 = vector.shape_cast %41 : vector<8x1xf32> to vector<1x8x1xf32>
      %c0_28 = arith.constant 0 : index
      %c0_29 = arith.constant 0 : index
      %c0_30 = arith.constant 0 : index
      %49 = vector.load %arg4[%c0_28, %c0_29, %c0_30] : memref<1x8x1xf32, #tpu.memory_space<vmem>>, vector<1x8x1xf32>
      tpu.vector_store %arg4[%c0_28, %c0_29, %c0_30], %48 {strides = array<i32>} : memref<1x8x1xf32, #tpu.memory_space<vmem>>, vector<1x8x1xf32>,
      %50 = vector.shape_cast %44 : vector<8x1xf32> to vector<1x8x1xf32>
      %c0_31 = arith.constant 0 : index
      %c0_32 = arith.constant 0 : index
      %c0_33 = arith.constant 0 : index
      %51 = vector.load %arg5[%c0_31, %c0_32, %c0_33] : memref<1x8x1xf32, #tpu.memory_space<vmem>>, vector<1x8x1xf32>
      tpu.vector_store %arg5[%c0_31, %c0_32, %c0_33], %50 {strides = array<i32>} : memref<1x8x1xf32, #tpu.memory_space<vmem>>, vector<1x8x1xf32>,
      %52 = vector.shape_cast %47 : vector<8x1xf32> to vector<1x8x1xf32>
      %c0_34 = arith.constant 0 : index
      %c0_35 = arith.constant 0 : index
      %c0_36 = arith.constant 0 : index
      %53 = vector.load %arg6[%c0_34, %c0_35, %c0_36] : memref<1x8x1xf32, #tpu.memory_space<vmem>>, vector<1x8x1xf32>
      tpu.vector_store %arg6[%c0_34, %c0_35, %c0_36], %52 {strides = array<i32>} : memref<1x8x1xf32, #tpu.memory_space<vmem>>, vector<1x8x1xf32>,
    } else {
    }
    return
  }
  func.func @transform_0(%arg0: i32, %arg1: i32) -> (i32, i32) {
    %c2_i32 = arith.constant 2 : i32
    %0 = arith.muli %arg0, %c2_i32 : i32
    %1 = arith.addi %0, %arg1 : i32
    %c0_i32 = arith.constant 0 : i32
    %c0_i32_0 = arith.constant 0 : i32
    return %c0_i32, %1 : i32, i32
  }
  func.func @transform_1(%arg0: i32, %arg1: i32) -> (i32, i32) {
    %c2_i32 = arith.constant 2 : i32
    %0 = arith.muli %arg0, %c2_i32 : i32
    %1 = arith.addi %0, %arg1 : i32
    %c0_i32 = arith.constant 0 : i32
    %c0_i32_0 = arith.constant 0 : i32
    return %c0_i32, %1 : i32, i32
  }
  func.func @transform_2(%arg0: i32, %arg1: i32) -> (i32, i32, i32) {
    %c0_i32 = arith.constant 0 : i32
    %c0_i32_0 = arith.constant 0 : i32
    %c0_i32_1 = arith.constant 0 : i32
    return %arg0, %c0_i32, %c0_i32_0 : i32, i32, i32
  }
  func.func @transform_3(%arg0: i32, %arg1: i32) -> (i32, i32, i32) {
    %c0_i32 = arith.constant 0 : i32
    %c0_i32_0 = arith.constant 0 : i32
    %c0_i32_1 = arith.constant 0 : i32
    return %arg0, %c0_i32, %c0_i32_0 : i32, i32, i32
  }
  func.func @transform_4(%arg0: i32, %arg1: i32) -> (i32, i32, i32) {
    %c0_i32 = arith.constant 0 : i32
    %c0_i32_0 = arith.constant 0 : i32
    %c0_i32_1 = arith.constant 0 : i32
    return %arg0, %c0_i32, %c0_i32_0 : i32, i32, i32
  }
}

</mosaic_0001>

<bundles_post_ra>
// kernel: tpu_custom_call.1
= control target key start
LH: loop header
LB: loop body
LE: loop exit
PB: predicated region body
PF: predicated region fallthrough
CT: control target
= control target key end

     0   :  { %10 = vsyncpa [#allocation6], 0  ;;  %s952_s0 = inlined_call_operand.hbm [shape: f32[8,512], index: 0, kind: input, shape index: {}]   ;;  %s953_s1 = inlined_call_operand.hbm [shape: s32[1,512], index: 1, kind: input, shape index: {}]   ;;  %s954_s2 = inlined_call_operand.vmem [shape: f32[2,8,1], index: 2, kind: output, shape index: {0}]   ;;  %s955_s3 = inlined_call_operand.vmem [shape: f32[2,8,1], index: 3, kind: output, shape index: {1}]   ;;  %s956_s4 = inlined_call_operand.vmem [shape: f32[2,8,1], index: 4, kind: output, shape index: {2}]  }
   0x1   :  { %12 = vsyncpa [#allocation6 + $0x1], 0 }
   0x2   :  { %13 = vsyncpa [#allocation8], 0 }
   0x3   :  { %15 = vsyncpa [#allocation8 + $0x1], 0  ;;  %s791_s15 = smov 0   ;;  %s793_s16 = smov 0  }
   0x4   :  { %s795_s17 = smov 0   ;;  %s797_s18 = smov 0  }
   0x5   :  { %s799_s19 = smov 0   ;;  %s801_s20 = smov 0  }
   0x6   :  { %s803_s21 = smov 0   ;;  %s805_s22 = smov 0  }
   0x7 LB: > { %s526_s23 = sadd.s32 4294967295, %s762_s22   ;;  %s30_s24 = sadd.s32 1, %s754_s20  ;;  %s762_s22 = sphi %s805_s22, %s21_s22   ;;  %s758_s21 = sphi %s803_s21, %s968_s21   ;;  %s754_s20 = sphi %s801_s20, %s967_s20   ;;  %s750_s19 = sphi %s799_s19, %s966_s19   ;;  %s746_s18 = sphi %s797_s18, %s965_s18   ;;  %s742_s17 = sphi %s795_s17, %s964_s17   ;;  %s738_s16 = sphi %s793_s16, %s963_s16   ;;  %s734_s15 = sphi %s791_s15, %s962_s15  }
   0x8   : > { %p31_p0 = scmp.ge.s32.totalorder %s30_s24, 2  ;;  %s33_s25 = sadd.s32 1, %s758_s21 }
   0x9   : > { %s528_s26 = sshll.u32 %s758_s21, 1  ;;  %s44_s27 = sadd.s32 1, %s742_s17 }
   0xa   : > { %s970_s24 = smov (%p31_p0, %s30_s24), 0  ;;  %s972_s25 = smov (!%p31_p0, %s33_s25), %s758_s21 }
   0xb   : > { %s838_s28 = sadd.s32 %s754_s20, %s528_s26  ;;  %p51_p1 = scmp.ne.s32.totalorder %s742_s17, %s738_s16 }
   0xc   : > { %p35_p2 = scmp.ge.s32.totalorder %s972_s25, 2  ;;  %p52_p3 = scmp.eq.s32.totalorder %s762_s22, 0 }
   0xd   : > { %p57_p4 = scmp.ne.s32.totalorder %s738_s16, %s734_s15  ;;  %p58_p5 = scmp.eq.s32.totalorder %s526_s23, 0 }
   0xe   : > { %s974_s25 = smov (%p35_p2, %s972_s25), 0  ;;  %p846_p6 = por %p52_p3, %p51_p1 }
   0xf   : > { %958 = sst [smem:[#allocation11_spill]] %s974_s25  ;;  %p850_p7 = por %p58_p5, %p57_p4 }
  0x10   : > { %s529_s5 = sshll.u32 %s974_s25, 1  ;;  %p560_p8 = scmp.lt.s32.totalorder %s762_s22, 4 }
  0x11   : > { %s40_s6 = sadd.s32 %s529_s5, %s970_s24  ;;  %s189_s8 = sand.u32 1, %s742_s17  }
  0x12   : > { %s41_s7 = ssub.s32 %s838_s28, %s40_s6  ;;  %s534_s9 = sshll.u32 %s189_s8, 3 }
  0x13   : > { %p42_p9 = scmp.eq.s32.totalorder %s41_s7, 0  ;;  %s536_s10 = sshll.u32 %s838_s28, 3 }
  0x14   : > { %s199_s14 = scalar_lea.hbm %s952_s0, %s536_s10  ;;  %s193_s23 = scalar_lea.vmem [#allocation5], %s534_s9 }
  0x15   : > { %s861_s11 = scalar_select %p42_p9, %s742_s17, %s44_s27  }
  0x16   : > { %s201_s15 = sshll.u32 %s199_s14, 4  ;;  %s203_s26 = sshll.u32 %s193_s23, 4  ;;  %s202_s15 = int_to_ptr.hbm [resolvable:$true] %s201_s15  ;;  %s204_s26 = int_to_ptr.vmem [resolvable:$true] %s203_s26 }
  0x17   : > { %p554_p10 = pnand %p560_p8, %p846_p6  ;;  %p538_p11 = scmp.ge.s32.totalorder %s762_s22, 1 }
  0x18   : > { %p227_p12 = scmp.lt.s32.totalorder %s762_s22, 5  ;;  %s190_s5 = scalar_lea.sflag [#allocation6], %s189_s8 }
  0x19   : > { %556 = dma.hbm_to_vmem [thread:$0]  (!%p554_p10), %s202_s15, 128, %s204_s26, %s190_s5  }
  0x1a   : > { %p228_p13 = pnand %p538_p11, %p227_p12  ;;  %s218_s7 = scalar_lea.hbm %s953_s1, %s838_s28 }
  0x1b   : > { %s220_s25 = sshll.u32 %s218_s7, 4  ;;  %s213_s12 = scalar_lea.vmem [#allocation7], %s189_s8  ;;  %s221_s25 = int_to_ptr.hbm [resolvable:$true] %s220_s25 }
  0x1c   : > { %s222_s10 = sshll.u32 %s213_s12, 4  ;;  %s211_s9 = scalar_lea.sflag [#allocation8], %s189_s8  ;;  %s223_s10 = int_to_ptr.vmem [resolvable:$true] %s222_s10 }
  0x1d   : > { %559 = dma.hbm_to_vmem [thread:$0]  (!%p554_p10), %s221_s25, 16, %s223_s10, %s211_s9  }
  0x1e   : > { %231 = sbr.rel (%p228_p13) target bundleno = 231 (0xe7), region = 28  ;;  %s877_s29 = sand.u32 (!%p228_p13), 1, %s738_s16  }
  0x1f   : > { %s539_s13 = sshll.u32 (!%p228_p13), %s877_s29, 3  ;;  %s234_s14 = scalar_lea.sflag (!%p228_p13), [#allocation6], %s877_s29 }
  0x20   : > { %s237_s15 = scalar_lea.vmem (!%p228_p13), [#allocation5], %s539_s13 }
  0x23   : > { %725 = dma.done.wait (%p850_p7), %s234_s14, 128  }
  0x24   : > { %727 = vsyncadd (%p850_p7), %s234_s14, 4294967168  ;;  %s244_s28 = scalar_lea.sflag [#allocation8], %s877_s29  ;;  %s246_s25 = scalar_lea.vmem [#allocation7], %s877_s29 }
  0x25   : > { %729 = dma.done.wait (%p850_p7), %s244_s28, 16  }
  0x26   : > { %731 = vsyncadd (%p850_p7), %s244_s28, 4294967280  ;;  %p287_p0 = scmp.lt.s32.totalorder %s750_s19, 1  ;;  %p543_p1 = scmp.ne.s32.totalorder %s746_s18, 0 }
  0x28   : > { %s976_s19 = smov (!%p287_p0, %s750_s19), 1  ;;  %302 = sbr.rel (%p543_p1) target bundleno = 49 (0x31), region = 40 }
  0x29   : > { %s893_s8 = sshll.u32 %s976_s19, 3 }
  0x2a   : > { %s290_s5 = scalar_lea.vmem %s954_s2, %s893_s8  ;;  %s294_s7 = scalar_lea.vmem %s955_s3, %s893_s8 }
  0x2b   : > { %s298_s10 = scalar_lea.vmem %s956_s4, %s893_s8 }
  0x2d   : > { %v764_v0 = vmov 0.0  }
  0x2e   : > { %303 = vst [vmem:[#allocation2] sm:$0xff] %v764_v0 }
  0x2f   : > { %304 = vst [vmem:[#allocation3] sm:$0xff] %v764_v0 }
  0x30   : > { %305 = vst [vmem:[#allocation4] sm:$0xff] %v764_v0 }
  0x31 PF: > { %v306_v1 = vld [vmem:[%s237_s15] sm:$0xff]  ;;  %v332_v7 = vlaneseq  ;;  %v765_v13 = vmov 0.0   ;;  %p546_p2 = scmp.ne.s32.totalorder %s746_s18, 1 }
  0x32   : > { %v308_v2 = vrot.slane %v306_v1, 4  ;;  %v627_v10 = vld [vmem:[%s246_s25] ss:$0 sm:$0xff] }
  0x33   : > { %v333_v9 = vshrl.u32 %v332_v7, 7  ;;  %v307_v22 = vld [vmem:[%s246_s25] sm:$0x1] }
  0x34   : > { %v309_v3 = vmax.f32 %v306_v1, %v308_v2  ;;  %vm325_vm1 = vcmp.ge.s32.totalorder %v307_v22, 0 }
  0x35   : > { %vm335_vm0 = vcmp.eq.s32.totalorder %v333_v9, %v627_v10  ;;  %v544_v25 = vsel %vm325_vm1, 1.0, %v765_v13  ;;  %v338_v29 = vld [vmem:[#allocation2] sm:$0xff] }
  0x36   : > { %v310_v4 = vrot.slane %v309_v3, 2  ;;  %v545_v14 = vsel %vm335_vm0, 1.0, %v765_v13  ;;  %v341_v15 = vld [vmem:[#allocation3] sm:$0xff]  ;;  %v329_v26 = vperm.slane %v544_v25, 0 }
  0x37   : > { %v342_v16 = vadd.f32 %v545_v14, %v341_v15  ;;  %v344_v31 = vld [vmem:[#allocation4] sm:$0xff] }
  0x38   : > { %v311_v5 = vmax.f32 %v309_v3, %v310_v4 }
  0x39   : > { %343 = vst [vmem:[#allocation3] sm:$0xff] %v342_v16 }
  0x3a   : > { %v312_v6 = vrot.slane %v311_v5, 1 }
  0x3c   : > { %v313_v8 = vmax.f32 %v311_v5, %v312_v6 }
  0x3e   : > { %v314_v11 = vsub.f32 %v306_v1, %v313_v8 }
  0x40   : > { %v315_v12 = vmul.f32 1.442695, %v314_v11 }
  0x42   : > { %628 = vpow2.f32 %v315_v12 }
  0x48   : > { %v629_v17 = vpop.eup %628 }
  0x49   : > { %v317_v18 = vrot.slane %v629_v17, 4 }
  0x4b   : > { %v318_v19 = vadd.f32 %v629_v17, %v317_v18 }
  0x4d   : > { %v319_v20 = vrot.slane %v318_v19, 2 }
  0x4f   : > { %v320_v21 = vadd.f32 %v319_v20, %v318_v19 }
  0x51   : > { %v321_v23 = vrot.slane %v320_v21, 1 }
  0x53   : > { %v322_v24 = vadd.f32 %v321_v23, %v320_v21 }
  0x55   : > { %630 = vrcp.f32 %v322_v24 }
  0x5b   : > { %v631_v27 = vpop.eup %630 }
  0x5c   : > { %v324_v28 = vmul.f32 %v631_v27, %v629_v17 }
  0x5e   : > { %v331_v30 = vmul.f32 %v329_v26, %v324_v28 }
  0x60   : > { %v339_v32 = vadd.f32 %v338_v29, %v331_v30  ;;  %v345_v33 = vmul.f32 %v545_v14, %v331_v30  ;;  %351 = sbr.rel (%p546_p2) target bundleno = 231 (0xe7), region = 44 }
  0x62   : > { %340 = vst [vmem:[#allocation2] sm:$0xff] %v339_v32  ;;  %v346_v34 = vadd.f32 %v345_v33, %v344_v31 }
  0x64   : > { %347 = vst [vmem:[#allocation4] sm:$0xff] %v346_v34 }
  0x65   : > { %v355_v37 = vld [vmem:[#allocation3] sm:$0xff]  ;;  %vm361_vm2 = vcmask 7168  }
  0x69   : > { %v352_v35 = vld [vmem:[#allocation2] sm:$0xff] }
  0x6a   : > { %353 = vadd.xlane.f32.xlu0 %v352_v35 }
  0x6b   : > { %v358_v36 = vld [vmem:[#allocation4] sm:$0xff] }
  0x6c   : > { %359 = vadd.xlane.f32.xlu1 %v358_v36 }
  0x72   : > { %356 = vadd.xlane.f32.xlu0 %v355_v37 }
  0xdd   : > { %v354_v38 = vpop.xlane.xlu0 %353 }
  0xde   : > { %362 = vst.msk [vmem:[%s290_s5] sm:$0xff] %vm361_vm2, %v354_v38 }
  0xdf   : > { %v360_v39 = vpop.xlane.xlu1 %359 }
  0xe0   : > { %364 = vst.msk [vmem:[%s298_s10] sm:$0xff] %vm361_vm2, %v360_v39 }
  0xe5   : > { %v357_v40 = vpop.xlane.xlu0 %356 }
  0xe6   : > { %363 = vst.msk [vmem:[%s294_s7] sm:$0xff] %vm361_vm2, %v357_v40 }
  0xe7 PF: > { %s21_s22 = sadd.s32 1, %s762_s22   ;;  %s961_s28 = sld [smem:[#allocation11_spill]] }
  0xe8   : > { %p18_p3 = scmp.ge.s32.totalorder %s21_s22, 6   ;;  %s962_s15 = smov %s738_s16 }
  0xe9   : > { %s963_s16 = smov %s742_s17  ;;  %s964_s17 = smov %s861_s11 }
  0xea   : > { %s965_s18 = smov %s754_s20  ;;  %s966_s19 = smov %s758_s21 }
  0xeb   : > { %s967_s20 = smov %s970_s24  ;;  %20 = sbr.rel (!%p18_p3) target bundleno = 7 (0x7), region = 113 }
  0xed   : > { %s968_s21 = smov %s961_s28 }
  0xf0   :  { %412 = vsyncpa [#allocation6], 1 }
  0xf1   :  { %414 = vsyncpa [#allocation6 + $0x1], 1 }
  0xf2   :  { %415 = vsyncpa [#allocation8], 1 }
  0xf3   :  { %417 = vsyncpa [#allocation8 + $0x1], 1 }

</bundles_post_ra>
